<compile_context>
chip_gen: v7x
topology: tpu7x:2x2x1
jax: 0.10.0
libtpu: 0.0.40
codegen_flags: <defaults>
</compile_context>

<pallas_src>
import numpy as np
import jax
import jax.numpy as jnp
from jax import lax
from jax.experimental import pallas as pl
from jax.experimental.pallas import tpu as pltpu

EPS = 1e-5


# ----------------------------------------------------------------------------
# Fused kernel: one batch element per grid step.
#   cols1_ref : (1, K1, P1)   stage-1 im2col of this sample (K1=Cin*9, P1=H1*W1)
#   w1_ref    : (Cout, K1)    stage-1 conv weight (flattened (cin,kh,kw))
#   p1_ref    : (Cout, 4)     [bias, gamma, beta, prelu_alpha] of stage 1
#   w2t_ref   : (3, Cout, Cout)  stage-2 weight per width-tap kw
#   sel2_ref  : (3, P1, P2)   0/1 selectors implementing the (1,3)/s(1,2)/p(0,1)
#                             width gather (im2col) of stage 2 on the MXU
#   p2_ref    : (Cout, 4)     [bias, gamma, beta, prelu_alpha] of stage 2
#   o_ref     : (1, Cout, P2) stage-2 output (P2 = H2*W2)
# ----------------------------------------------------------------------------
def _fused_encoder_kernel(cols1_ref, w1_ref, p1_ref, w2t_ref, sel2_ref, p2_ref,
                          o_ref):
    # ---------------- stage 1: conv (MXU) + bias ----------------
    cols1 = cols1_ref[0]                                              # (K1, P1)
    y = jnp.dot(w1_ref[...], cols1, preferred_element_type=jnp.float32)
    y = y + p1_ref[:, 0:1]

    # InstanceNorm2d (biased var, eps=1e-5), single centered pass.
    mean = jnp.mean(y, axis=1, keepdims=True)
    yc = y - mean
    var = jnp.mean(yc * yc, axis=1, keepdims=True)
    y = yc * lax.rsqrt(var + EPS)
    y = y * p1_ref[:, 1:2] + p1_ref[:, 2:3]
    # PReLU (per-channel slope)
    y1 = jnp.where(y >= 0.0, y, p1_ref[:, 3:4] * y)                   # (Cout, P1)

    # ---------------- stage 2: in-kernel im2col + conv ----------------
    # y2 = sum_kw  W2[:, :, kw] @ (y1 @ Sel_kw)   — pure 2D matmuls, y1 stays
    # in VMEM/vregs, no strided lane access, no XLA glue.
    acc = None
    for kw in range(3):
        t = jnp.dot(y1, sel2_ref[kw], preferred_element_type=jnp.float32)   # (Cout, P2)
        u = jnp.dot(w2t_ref[kw], t, preferred_element_type=jnp.float32)     # (Cout, P2)
        acc = u if acc is None else acc + u
    y = acc + p2_ref[:, 0:1]

    mean = jnp.mean(y, axis=1, keepdims=True)
    yc = y - mean
    var = jnp.mean(yc * yc, axis=1, keepdims=True)
    y = yc * lax.rsqrt(var + EPS)
    y = y * p2_ref[:, 1:2] + p2_ref[:, 2:3]
    y = jnp.where(y >= 0.0, y, p2_ref[:, 3:4] * y)

    o_ref[0] = y.astype(o_ref.dtype)


# ----------------------------------------------------------------------------
# Glue: stage-1 im2col (tiny raw input; static slices + stack/reshape).
# Flattening order of axis 1 is (cin, kh, kw), matching w1.reshape(Cout, -1).
# ----------------------------------------------------------------------------
def _im2col(xpad, kh_size, kw_size, sh, sw, hout, wout):
    B, C = xpad.shape[0], xpad.shape[1]
    patches = []
    for kh in range(kh_size):
        for kw in range(kw_size):
            patches.append(
                xpad[:, :,
                     kh:kh + sh * (hout - 1) + 1:sh,
                     kw:kw + sw * (wout - 1) + 1:sw])        # (B, C, hout, wout)
    cols = jnp.stack(patches, axis=2)                         # (B, C, KK, hout, wout)
    return cols.reshape(B, C * kh_size * kw_size, hout * wout)


# Constant 0/1 selectors implementing the stage-2 (1,3)/stride-(1,2)/pad-(0,1)
# width gather as matmuls:  (y1 @ Sel_kw)[ci, h*W2+wo] = y1[ci, h*W1 + 2*wo+kw-1]
# (zero column for out-of-range taps, i.e. the padding).
def _make_stage2_selectors(H1, W1, W2, pad=1, stride=2):
    P1, P2 = H1 * W1, H1 * W2
    sel = np.zeros((3, P1, P2), np.float32)
    for kw in range(3):
        for h in range(H1):
            for wo in range(W2):
                wi = stride * wo + kw - pad
                if 0 <= wi < W1:
                    sel[kw, h * W1 + wi, h * W2 + wo] = 1.0
    return jnp.asarray(sel)


# ----------------------------------------------------------------------------
# Full ChannelEncoder_SF11 forward (single fused Pallas call).
# ----------------------------------------------------------------------------
def channel_encoder_sf11_pallas(x, params):
    B, Cin, H, W = x.shape
    Cout = params["w1"].shape[0]

    # conv_1: k=(3,3), s=(2,2), p=(1,0)
    H1 = (H + 2 - 3) // 2 + 1
    W1 = (W - 3) // 2 + 1
    # conv_2: k=(1,3), s=(1,2), p=(0,1)
    H2 = H1
    W2 = (W1 + 2 - 3) // 2 + 1
    K1 = Cin * 9
    P1 = H1 * W1
    P2 = H2 * W2

    # stage-1 im2col on the tiny raw input (stays in XLA, a handful of ops).
    xpad = jnp.pad(x, ((0, 0), (0, 0), (1, 1), (0, 0)))
    cols1 = _im2col(xpad, 3, 3, 2, 2, H1, W1)                 # (B, K1, P1)

    # Packed per-stage parameters: [bias, gamma, beta, alpha] as (Cout, 4).
    w1_2d = params["w1"].reshape(Cout, K1)
    w2_taps = jnp.transpose(params["w2"][:, :, 0, :], (2, 0, 1))   # (3, Cout, Cout)
    p1 = jnp.stack([params["b1"], params["g1"], params["bt1"], params["a1"]], axis=1)
    p2 = jnp.stack([params["b2"], params["g2"], params["bt2"], params["a2"]], axis=1)
    sel2 = _make_stage2_selectors(H1, W1, W2)                  # (3, P1, P2)

    flops = B * (2 * Cout * K1 * P1
                 + 3 * (2 * Cout * P1 * P2 + 2 * Cout * Cout * P2)
                 + 12 * Cout * (P1 + P2))
    bytes_accessed = 4 * (cols1.size + w1_2d.size + w2_taps.size + sel2.size
                          + p1.size + p2.size + B * Cout * P2)

    y2 = pl.pallas_call(
        _fused_encoder_kernel,
        out_shape=jax.ShapeDtypeStruct((B, Cout, P2), jnp.float32),
        grid=(B,),
        in_specs=[
            pl.BlockSpec((1, K1, P1), lambda b: (b, 0, 0)),
            pl.BlockSpec((Cout, K1), lambda b: (0, 0)),
            pl.BlockSpec((Cout, 4), lambda b: (0, 0)),
            pl.BlockSpec((3, Cout, Cout), lambda b: (0, 0, 0)),
            pl.BlockSpec((3, P1, P2), lambda b: (0, 0, 0)),
            pl.BlockSpec((Cout, 4), lambda b: (0, 0)),
        ],
        out_specs=pl.BlockSpec((1, Cout, P2), lambda b: (b, 0, 0)),
        compiler_params=pltpu.CompilerParams(dimension_semantics=("parallel",)),
        cost_estimate=pl.CostEstimate(flops=flops,
                                      transcendentals=2 * B * Cout,
                                      bytes_accessed=bytes_accessed),
    )(cols1, w1_2d, p1, w2_taps, sel2, p2)

    # ---- final view/permute (mod_fact = 2); 4 KB total, trivial in XLA ----
    mod_fact = 2
    time_extra = W2 // mod_fact
    out = y2.reshape(B, Cout, H2, time_extra, mod_fact)
    out = jnp.transpose(out, (0, 1, 3, 2, 4))
    return out.reshape(B, Cout * time_extra, H2 * mod_fact)


# ----------------------------------------------------------------------------
# Pure-JAX reference (mirrors the PyTorch forward exactly) for validation.
# ----------------------------------------------------------------------------
def _instance_norm(y, g, b):
    mean = jnp.mean(y, axis=(2, 3), keepdims=True)
    var = jnp.mean(jnp.square(y - mean), axis=(2, 3), keepdims=True)
    return (y - mean) * lax.rsqrt(var + EPS) * g[None, :, None, None] + b[None, :, None, None]


def _prelu(y, a):
    return jnp.where(y >= 0.0, y, a[None, :, None, None] * y)


def channel_encoder_sf11_ref(x, params):
    dn = ("NCHW", "OIHW", "NCHW")
    y = lax.conv_general_dilated(x, params["w1"], (2, 2), [(1, 1), (0, 0)],
                                 dimension_numbers=dn)
    y = y + params["b1"][None, :, None, None]
    y = _prelu(_instance_norm(y, params["g1"], params["bt1"]), params["a1"])

    y = lax.conv_general_dilated(y, params["w2"], (1, 2), [(0, 0), (1, 1)],
                                 dimension_numbers=dn)
    y = y + params["b2"][None, :, None, None]
    y = _prelu(_instance_norm(y, params["g2"], params["bt2"]), params["a2"])

    B, C, H2, W2 = y.shape
    te = W2 // 2
    y = y.reshape(B, C, H2, te, 2).transpose(0, 1, 3, 2, 4).reshape(B, C * te, H2 * 2)
    return y


# ----------------------------------------------------------------------------
def make_params(key, in_channel, channels):
    ks = jax.random.split(key, 10)
    return {
        "w1": 0.1 * jax.random.normal(ks[0], (channels, in_channel, 3, 3), jnp.float32),
        "b1": 0.1 * jax.random.normal(ks[1], (channels,), jnp.float32),
        "g1": 1.0 + 0.1 * jax.random.normal(ks[2], (channels,), jnp.float32),
        "bt1": 0.1 * jax.random.normal(ks[3], (channels,), jnp.float32),
        "a1": 0.25 + 0.05 * jax.random.normal(ks[4], (channels,), jnp.float32),
        "w2": 0.1 * jax.random.normal(ks[5], (channels, channels, 1, 3), jnp.float32),
        "b2": 0.1 * jax.random.normal(ks[6], (channels,), jnp.float32),
        "g2": 1.0 + 0.1 * jax.random.normal(ks[7], (channels,), jnp.float32),
        "bt2": 0.1 * jax.random.normal(ks[8], (channels,), jnp.float32),
        "a2": 0.25 + 0.05 * jax.random.normal(ks[9], (channels,), jnp.float32),
    }


if __name__ == "__main__":
    key = jax.random.PRNGKey(0)
    k_x, k_p = jax.random.split(key)

    B, Cin, H, W = 2, 2, 16, 16          # small NCHW input (IQ channels)
    channels = 32
    x = jax.random.normal(k_x, (B, Cin, H, W), jnp.float32)
    params = make_params(k_p, Cin, channels)

    out = jax.block_until_ready(channel_encoder_sf11_pallas(x, params))
    ref = jax.block_until_ready(channel_encoder_sf11_ref(x, params))

    assert out.shape == ref.shape, (out.shape, ref.shape)
    max_err = float(jnp.max(jnp.abs(out - ref)))
    assert max_err < 1e-3, f"max abs error too large: {max_err}"

    print("KERNEL_OK")
</pallas_src>

<mosaic_0001>
module attributes {stable_mosaic.version = 11 : i64} {
  func.func @_fused_encoder_kernel(%arg0: i32, %arg1: memref<1x18x56xf32, #tpu.memory_space<vmem>>, %arg2: memref<32x18xf32, #tpu.memory_space<vmem>>, %arg3: memref<32x4xf32, #tpu.memory_space<vmem>>, %arg4: memref<3x32x32xf32, #tpu.memory_space<vmem>>, %arg5: memref<3x56x32xf32, #tpu.memory_space<vmem>>, %arg6: memref<32x4xf32, #tpu.memory_space<vmem>>, %arg7: memref<1x32x32xf32, #tpu.memory_space<vmem>>) attributes {dimension_semantics = [#tpu.dimension_semantics<parallel>], iteration_bounds = array<i64: 2>, scalar_prefetch = 0 : i64, scratch_operands = 0 : i64, tpu.core_type = #tpu.core_type<tc>, window_params = [{transform_indices = @transform_0, window_bounds = array<i64: 1, 18, 56>}, {pipeline_mode = #tpu.pipeline_mode<synchronous>, transform_indices = @transform_1, window_bounds = array<i64: 32, 18>}, {pipeline_mode = #tpu.pipeline_mode<synchronous>, transform_indices = @transform_2, window_bounds = array<i64: 32, 4>}, {pipeline_mode = #tpu.pipeline_mode<synchronous>, transform_indices = @transform_3, window_bounds = array<i64: 3, 32, 32>}, {pipeline_mode = #tpu.pipeline_mode<synchronous>, transform_indices = @transform_4, window_bounds = array<i64: 3, 56, 32>}, {pipeline_mode = #tpu.pipeline_mode<synchronous>, transform_indices = @transform_5, window_bounds = array<i64: 32, 4>}, {transform_indices = @transform_6, window_bounds = array<i64: 1, 32, 32>}]} {
    %c0 = arith.constant 0 : index
    %c0_0 = arith.constant 0 : index
    %c0_1 = arith.constant 0 : index
    %0 = vector.load %arg1[%c0, %c0_0, %c0_1] : memref<1x18x56xf32, #tpu.memory_space<vmem>>, vector<1x18x56xf32>
    %1 = vector.shape_cast %0 : vector<1x18x56xf32> to vector<18x56xf32>
    %c0_2 = arith.constant 0 : index
    %c0_3 = arith.constant 0 : index
    %2 = vector.load %arg2[%c0_2, %c0_3] : memref<32x18xf32, #tpu.memory_space<vmem>>, vector<32x18xf32>
    %cst = arith.constant dense<0.000000e+00> : vector<32x56xf32>
    %3 = tpu.matmul %2, %1, %cst {dimension_numbers = #tpu.dot_dimension_numbers<[1], [0], [0], [1], [0, 0, 1, 1], [], []>} : vector<32x18xf32>, vector<18x56xf32>, vector<32x56xf32> -> vector<32x56xf32>
    %c0_4 = arith.constant 0 : index
    %c0_5 = arith.constant 0 : index
    %4 = vector.load %arg3[%c0_4, %c0_5] : memref<32x4xf32, #tpu.memory_space<vmem>>, vector<32x1xf32>
    %5 = vector.broadcast %4 : vector<32x1xf32> to vector<32x56xf32>
    %6 = arith.addf %3, %5 : vector<32x56xf32>
    %cst_6 = arith.constant dense<0.000000e+00> : vector<32xf32>
    %7 = vector.multi_reduction <add>, %6, %cst_6 [1] : vector<32x56xf32> to vector<32xf32>
    %8 = vector.shape_cast %7 : vector<32xf32> to vector<32x1xf32>
    %cst_7 = arith.constant 5.600000e+01 : f32
    %9 = vector.broadcast %cst_7 : f32 to vector<32x1xf32>
    %10 = arith.divf %8, %9 : vector<32x1xf32>
    %11 = vector.broadcast %10 : vector<32x1xf32> to vector<32x56xf32>
    %12 = arith.subf %6, %11 : vector<32x56xf32>
    %13 = arith.mulf %12, %12 : vector<32x56xf32>
    %cst_8 = arith.constant dense<0.000000e+00> : vector<32xf32>
    %14 = vector.multi_reduction <add>, %13, %cst_8 [1] : vector<32x56xf32> to vector<32xf32>
    %15 = vector.shape_cast %14 : vector<32xf32> to vector<32x1xf32>
    %cst_9 = arith.constant 5.600000e+01 : f32
    %16 = vector.broadcast %cst_9 : f32 to vector<32x1xf32>
    %17 = arith.divf %15, %16 : vector<32x1xf32>
    %cst_10 = arith.constant 9.99999974E-6 : f32
    %18 = vector.broadcast %cst_10 : f32 to vector<32x1xf32>
    %19 = arith.addf %17, %18 : vector<32x1xf32>
    %20 = math.rsqrt %19 : vector<32x1xf32>
    %21 = vector.broadcast %20 : vector<32x1xf32> to vector<32x56xf32>
    %22 = arith.mulf %12, %21 : vector<32x56xf32>
    %c0_11 = arith.constant 0 : index
    %c1 = arith.constant 1 : index
    %23 = vector.load %arg3[%c0_11, %c1] : memref<32x4xf32, #tpu.memory_space<vmem>>, vector<32x1xf32>
    %24 = vector.broadcast %23 : vector<32x1xf32> to vector<32x56xf32>
    %25 = arith.mulf %22, %24 : vector<32x56xf32>
    %c0_12 = arith.constant 0 : index
    %c2 = arith.constant 2 : index
    %26 = vector.load %arg3[%c0_12, %c2] : memref<32x4xf32, #tpu.memory_space<vmem>>, vector<32x1xf32>
    %27 = vector.broadcast %26 : vector<32x1xf32> to vector<32x56xf32>
    %28 = arith.addf %25, %27 : vector<32x56xf32>
    %cst_13 = arith.constant 0.000000e+00 : f32
    %29 = vector.broadcast %cst_13 : f32 to vector<32x56xf32>
    %30 = arith.cmpf oge, %28, %29 : vector<32x56xf32>
    %c0_14 = arith.constant 0 : index
    %c3 = arith.constant 3 : index
    %31 = vector.load %arg3[%c0_14, %c3] : memref<32x4xf32, #tpu.memory_space<vmem>>, vector<32x1xf32>
    %32 = vector.broadcast %31 : vector<32x1xf32> to vector<32x56xf32>
    %33 = arith.mulf %32, %28 : vector<32x56xf32>
    %34 = arith.select %30, %28, %33 : vector<32x56xi1>, vector<32x56xf32>
    %c0_15 = arith.constant 0 : index
    %c0_16 = arith.constant 0 : index
    %c0_17 = arith.constant 0 : index
    %35 = vector.load %arg5[%c0_15, %c0_16, %c0_17] : memref<3x56x32xf32, #tpu.memory_space<vmem>>, vector<1x56x32xf32>
    %36 = vector.shape_cast %35 : vector<1x56x32xf32> to vector<56x32xf32>
    %cst_18 = arith.constant dense<0.000000e+00> : vector<32x32xf32>
    %37 = tpu.matmul %34, %36, %cst_18 {dimension_numbers = #tpu.dot_dimension_numbers<[1], [0], [0], [1], [0, 0, 1, 1], [], []>} : vector<32x56xf32>, vector<56x32xf32>, vector<32x32xf32> -> vector<32x32xf32>
    %c0_19 = arith.constant 0 : index
    %c0_20 = arith.constant 0 : index
    %c0_21 = arith.constant 0 : index
    %38 = vector.load %arg4[%c0_19, %c0_20, %c0_21] : memref<3x32x32xf32, #tpu.memory_space<vmem>>, vector<1x32x32xf32>
    %39 = vector.shape_cast %38 : vector<1x32x32xf32> to vector<32x32xf32>
    %cst_22 = arith.constant dense<0.000000e+00> : vector<32x32xf32>
    %40 = tpu.matmul %39, %37, %cst_22 {dimension_numbers = #tpu.dot_dimension_numbers<[1], [0], [0], [1], [0, 0, 1, 1], [], []>} : vector<32x32xf32>, vector<32x32xf32>, vector<32x32xf32> -> vector<32x32xf32>
    %c1_23 = arith.constant 1 : index
    %c0_24 = arith.constant 0 : index
    %c0_25 = arith.constant 0 : index
    %41 = vector.load %arg5[%c1_23, %c0_24, %c0_25] : memref<3x56x32xf32, #tpu.memory_space<vmem>>, vector<1x56x32xf32>
    %42 = vector.shape_cast %41 : vector<1x56x32xf32> to vector<56x32xf32>
    %cst_26 = arith.constant dense<0.000000e+00> : vector<32x32xf32>
    %43 = tpu.matmul %34, %42, %cst_26 {dimension_numbers = #tpu.dot_dimension_numbers<[1], [0], [0], [1], [0, 0, 1, 1], [], []>} : vector<32x56xf32>, vector<56x32xf32>, vector<32x32xf32> -> vector<32x32xf32>
    %c1_27 = arith.constant 1 : index
    %c0_28 = arith.constant 0 : index
    %c0_29 = arith.constant 0 : index
    %44 = vector.load %arg4[%c1_27, %c0_28, %c0_29] : memref<3x32x32xf32, #tpu.memory_space<vmem>>, vector<1x32x32xf32>
    %45 = vector.shape_cast %44 : vector<1x32x32xf32> to vector<32x32xf32>
    %cst_30 = arith.constant dense<0.000000e+00> : vector<32x32xf32>
    %46 = tpu.matmul %45, %43, %cst_30 {dimension_numbers = #tpu.dot_dimension_numbers<[1], [0], [0], [1], [0, 0, 1, 1], [], []>} : vector<32x32xf32>, vector<32x32xf32>, vector<32x32xf32> -> vector<32x32xf32>
    %47 = arith.addf %40, %46 : vector<32x32xf32>
    %c2_31 = arith.constant 2 : index
    %c0_32 = arith.constant 0 : index
    %c0_33 = arith.constant 0 : index
    %48 = vector.load %arg5[%c2_31, %c0_32, %c0_33] : memref<3x56x32xf32, #tpu.memory_space<vmem>>, vector<1x56x32xf32>
    %49 = vector.shape_cast %48 : vector<1x56x32xf32> to vector<56x32xf32>
    %cst_34 = arith.constant dense<0.000000e+00> : vector<32x32xf32>
    %50 = tpu.matmul %34, %49, %cst_34 {dimension_numbers = #tpu.dot_dimension_numbers<[1], [0], [0], [1], [0, 0, 1, 1], [], []>} : vector<32x56xf32>, vector<56x32xf32>, vector<32x32xf32> -> vector<32x32xf32>
    %c2_35 = arith.constant 2 : index
    %c0_36 = arith.constant 0 : index
    %c0_37 = arith.constant 0 : index
    %51 = vector.load %arg4[%c2_35, %c0_36, %c0_37] : memref<3x32x32xf32, #tpu.memory_space<vmem>>, vector<1x32x32xf32>
    %52 = vector.shape_cast %51 : vector<1x32x32xf32> to vector<32x32xf32>
    %cst_38 = arith.constant dense<0.000000e+00> : vector<32x32xf32>
    %53 = tpu.matmul %52, %50, %cst_38 {dimension_numbers = #tpu.dot_dimension_numbers<[1], [0], [0], [1], [0, 0, 1, 1], [], []>} : vector<32x32xf32>, vector<32x32xf32>, vector<32x32xf32> -> vector<32x32xf32>
    %54 = arith.addf %47, %53 : vector<32x32xf32>
    %c0_39 = arith.constant 0 : index
    %c0_40 = arith.constant 0 : index
    %55 = vector.load %arg6[%c0_39, %c0_40] : memref<32x4xf32, #tpu.memory_space<vmem>>, vector<32x1xf32>
    %56 = vector.broadcast %55 : vector<32x1xf32> to vector<32x32xf32>
    %57 = arith.addf %54, %56 : vector<32x32xf32>
    %cst_41 = arith.constant dense<0.000000e+00> : vector<32xf32>
    %58 = vector.multi_reduction <add>, %57, %cst_41 [1] : vector<32x32xf32> to vector<32xf32>
    %59 = vector.shape_cast %58 : vector<32xf32> to vector<32x1xf32>
    %cst_42 = arith.constant 3.200000e+01 : f32
    %60 = vector.broadcast %cst_42 : f32 to vector<32x1xf32>
    %61 = arith.divf %59, %60 : vector<32x1xf32>
    %62 = vector.broadcast %61 : vector<32x1xf32> to vector<32x32xf32>
    %63 = arith.subf %57, %62 : vector<32x32xf32>
    %64 = arith.mulf %63, %63 : vector<32x32xf32>
    %cst_43 = arith.constant dense<0.000000e+00> : vector<32xf32>
    %65 = vector.multi_reduction <add>, %64, %cst_43 [1] : vector<32x32xf32> to vector<32xf32>
    %66 = vector.shape_cast %65 : vector<32xf32> to vector<32x1xf32>
    %cst_44 = arith.constant 3.200000e+01 : f32
    %67 = vector.broadcast %cst_44 : f32 to vector<32x1xf32>
    %68 = arith.divf %66, %67 : vector<32x1xf32>
    %cst_45 = arith.constant 9.99999974E-6 : f32
    %69 = vector.broadcast %cst_45 : f32 to vector<32x1xf32>
    %70 = arith.addf %68, %69 : vector<32x1xf32>
    %71 = math.rsqrt %70 : vector<32x1xf32>
    %72 = vector.broadcast %71 : vector<32x1xf32> to vector<32x32xf32>
    %73 = arith.mulf %63, %72 : vector<32x32xf32>
    %c0_46 = arith.constant 0 : index
    %c1_47 = arith.constant 1 : index
    %74 = vector.load %arg6[%c0_46, %c1_47] : memref<32x4xf32, #tpu.memory_space<vmem>>, vector<32x1xf32>
    %75 = vector.broadcast %74 : vector<32x1xf32> to vector<32x32xf32>
    %76 = arith.mulf %73, %75 : vector<32x32xf32>
    %c0_48 = arith.constant 0 : index
    %c2_49 = arith.constant 2 : index
    %77 = vector.load %arg6[%c0_48, %c2_49] : memref<32x4xf32, #tpu.memory_space<vmem>>, vector<32x1xf32>
    %78 = vector.broadcast %77 : vector<32x1xf32> to vector<32x32xf32>
    %79 = arith.addf %76, %78 : vector<32x32xf32>
    %cst_50 = arith.constant 0.000000e+00 : f32
    %80 = vector.broadcast %cst_50 : f32 to vector<32x32xf32>
    %81 = arith.cmpf oge, %79, %80 : vector<32x32xf32>
    %c0_51 = arith.constant 0 : index
    %c3_52 = arith.constant 3 : index
    %82 = vector.load %arg6[%c0_51, %c3_52] : memref<32x4xf32, #tpu.memory_space<vmem>>, vector<32x1xf32>
    %83 = vector.broadcast %82 : vector<32x1xf32> to vector<32x32xf32>
    %84 = arith.mulf %83, %79 : vector<32x32xf32>
    %85 = arith.select %81, %79, %84 : vector<32x32xi1>, vector<32x32xf32>
    %c0_53 = arith.constant 0 : index
    %c0_54 = arith.constant 0 : index
    %c0_55 = arith.constant 0 : index
    %86 = vector.load %arg7[%c0_53, %c0_54, %c0_55] : memref<1x32x32xf32, #tpu.memory_space<vmem>>, vector<1x32x32xf32>
    %87 = vector.shape_cast %86 : vector<1x32x32xf32> to vector<32x32xf32>
    %88 = vector.shape_cast %85 : vector<32x32xf32> to vector<1x32x32xf32>
    tpu.vector_store %arg7[%c0_53, %c0_54, %c0_55], %88 {strides = array<i32>} : memref<1x32x32xf32, #tpu.memory_space<vmem>>, vector<1x32x32xf32>,
    return
  }
  func.func @transform_0(%arg0: i32) -> (i32, i32, i32) {
    %c0_i32 = arith.constant 0 : i32
    %c0_i32_0 = arith.constant 0 : i32
    %c0_i32_1 = arith.constant 0 : i32
    return %arg0, %c0_i32, %c0_i32_0 : i32, i32, i32
  }
  func.func @transform_1(%arg0: i32) -> (i32, i32) {
    %c0_i32 = arith.constant 0 : i32
    %c0_i32_0 = arith.constant 0 : i32
    %c0_i32_1 = arith.constant 0 : i32
    return %c0_i32, %c0_i32_0 : i32, i32
  }
  func.func @transform_2(%arg0: i32) -> (i32, i32) {
    %c0_i32 = arith.constant 0 : i32
    %c0_i32_0 = arith.constant 0 : i32
    %c0_i32_1 = arith.constant 0 : i32
    return %c0_i32, %c0_i32_0 : i32, i32
  }
  func.func @transform_3(%arg0: i32) -> (i32, i32, i32) {
    %c0_i32 = arith.constant 0 : i32
    %c0_i32_0 = arith.constant 0 : i32
    %c0_i32_1 = arith.constant 0 : i32
    %c0_i32_2 = arith.constant 0 : i32
    return %c0_i32, %c0_i32_0, %c0_i32_1 : i32, i32, i32
  }
  func.func @transform_4(%arg0: i32) -> (i32, i32, i32) {
    %c0_i32 = arith.constant 0 : i32
    %c0_i32_0 = arith.constant 0 : i32
    %c0_i32_1 = arith.constant 0 : i32
    %c0_i32_2 = arith.constant 0 : i32
    return %c0_i32, %c0_i32_0, %c0_i32_1 : i32, i32, i32
  }
  func.func @transform_5(%arg0: i32) -> (i32, i32) {
    %c0_i32 = arith.constant 0 : i32
    %c0_i32_0 = arith.constant 0 : i32
    %c0_i32_1 = arith.constant 0 : i32
    return %c0_i32, %c0_i32_0 : i32, i32
  }
  func.func @transform_6(%arg0: i32) -> (i32, i32, i32) {
    %c0_i32 = arith.constant 0 : i32
    %c0_i32_0 = arith.constant 0 : i32
    %c0_i32_1 = arith.constant 0 : i32
    return %arg0, %c0_i32, %c0_i32_0 : i32, i32, i32
  }
}

</mosaic_0001>

<bundles_post_ra>
// kernel: tpu_custom_call.1
= control target key start
LH: loop header
LB: loop body
LE: loop exit
PB: predicated region body
PF: predicated region fallthrough
CT: control target
= control target key end

     0   :  { %11 = vsyncpa [#allocation3], 0  ;;  %s2209_s0 = inlined_call_operand.vmem [shape: f32[2,18,56], index: 0, kind: input, shape index: {}]   ;;  %s2210_s1 = inlined_call_operand.vmem [shape: f32[32,18], index: 1, kind: input, shape index: {}]   ;;  %s2211_s2 = inlined_call_operand.vmem [shape: f32[32,4], index: 2, kind: input, shape index: {}]   ;;  %s2212_s3 = inlined_call_operand.vmem [shape: f32[3,32,32], index: 3, kind: input, shape index: {}]   ;;  %s2213_s4 = inlined_call_operand.vmem [shape: f32[3,56,32], index: 4, kind: input, shape index: {}]   ;;  %s2214_s5 = inlined_call_operand.vmem [shape: f32[32,4], index: 5, kind: input, shape index: {}]   ;;  %s2215_s6 = inlined_call_operand.hbm [shape: f32[2,32,32], index: 6, kind: output, shape index: {}]  }
   0x1   :  { %13 = vsyncpa [#allocation3 + $0x1], 0  ;;  %s1834_s21 = smov 0   ;;  %s1836_s22 = smov 0  }
   0x2   :  { %s1838_s23 = smov 0   ;;  %s1840_s24 = smov 0  }
   0x3 LB: > { %s1855_s25 = sadd.s32 4294967295, %s1790_s24   ;;  %s1334_s26 = sadd.s32 4294967294, %s1790_s24   ;;  %s1790_s24 = sphi %s1840_s24, %s2221_s24   ;;  %s1786_s23 = sphi %s1838_s23, %s2220_s23   ;;  %s1782_s22 = sphi %s1836_s22, %s2219_s22   ;;  %s1778_s21 = sphi %s1834_s21, %s2218_s21  }
   0x4   : > { %s1859_s27 = sadd.s32 1, %s1790_s24   ;;  %s157_s28 = sadd.s32 1, %s1786_s23 }
   0x5   : > { %s154_s29 = ssub.s32 %s1790_s24, %s1859_s27  ;;  %p167_p0 = scmp.ne.s32.totalorder %s1786_s23, %s1782_s22 }
   0x6   : > { %p155_p1 = scmp.eq.s32.totalorder %s154_s29, 0  ;;  %p168_p2 = scmp.eq.s32.totalorder %s1855_s25, 1 }
   0x7   : > { %p173_p3 = scmp.ne.s32.totalorder %s1782_s22, %s1778_s21  ;;  %p174_p4 = scmp.eq.s32.totalorder %s1334_s26, 1 }
   0x8   : > { %s1870_s30 = scalar_select %p155_p1, %s1786_s23, %s157_s28  }
   0x9   : > { %p1872_p5 = por %p168_p2, %p167_p0  ;;  %p1876_p6 = por %p174_p4, %p173_p3 }
   0xa   : > { %p1337_p7 = scmp.ge.s32.totalorder %s1790_s24, 1  ;;  %p215_p8 = scmp.lt.s32.totalorder %s1790_s24, 3 }
   0xc   : > { %p216_p9 = pnand %p1337_p7, %p215_p8 }
   0xd   : > { %p245_p10 = scmp.lt.s32.totalorder (!%p216_p9), %s1855_s25, 1  ;;  %v253_v0 = vld [vmem:[%s2210_s1] sm:$0xff] (!%p216_p9)  ;;  %vm281_vm0 = vcmask (!%p216_p9), 146432   ;;  %v1893_v2 = vld [vmem:[%s2211_s2 + $0x10] sm:$0xff] (!%p216_p9)  ;;  %v1792_v3 = vmov (!%p216_p9), 0   ;;  %v258_v4 = vld [vmem:[%s2211_s2 + $0x8] sm:$0xff] (!%p216_p9) }
   0xe   : > { %219 = sbr.rel (%p216_p9) target bundleno = 1409 (0x581), region = 44  ;;  %1467 = vmatprep.mubr.msk.f32.mxu0 (!%p216_p9), %vm281_vm0, %v253_v0  ;;  %v257_v1 = vld [vmem:[%s2211_s2] sm:$0xff] (!%p216_p9)  ;;  %1693 = vset.pattern.permute.xlu0 (!%p216_p9), %v1792_v3  ;;  %v1905_v5 = vld [vmem:[%s2211_s2 + $0x18] sm:$0xff] (!%p216_p9)  ;;  %vm294_vm1 = vcmask (!%p216_p9), 1041408   ;;  %v1793_v10 = vmov (!%p216_p9), 1   ;;  %v254_v11 = vld [vmem:[%s2210_s1 + $0x8] sm:$0xff] (!%p216_p9) }
   0xf   : > { %1694 = vset.pattern.permute.xlu1 (!%p216_p9), %v1792_v3  ;;  %263 = vperm.xlu0 (!%p216_p9), %1693, %v257_v1   ;;  %v255_v12 = vld [vmem:[%s2210_s1 + $0x10] sm:$0xff] (!%p216_p9)  ;;  %v256_v13 = vld [vmem:[%s2210_s1 + $0x18] sm:$0xff] (!%p216_p9)  ;;  %v1794_v14 = vmov (!%p216_p9), 2   ;;  %vm383_vm2 = vcmask (!%p216_p9), 457728   ;;  %v1795_v31 = vmov (!%p216_p9), 3   ;;  %v1350_v54 = vld [vmem:[%s2213_s4 + $0x40] sm:$0xff] (!%p216_p9) }
  0x10   : > { %273 = vperm.xlu1 (!%p216_p9), %1694, %v1893_v2   ;;  %v1349_v53 = vld [vmem:[%s2213_s4 + $0x38] sm:$0xff] (!%p216_p9)  ;;  %v505_v56 = vld [vmem:[%s2213_s4] sm:$0xff] (!%p216_p9)  ;;  %v506_v57 = vld [vmem:[%s2213_s4 + $0x8] sm:$0xff] (!%p216_p9)  ;;  %vm711_vm7 = vcmask (!%p216_p9), 261120   ;;  %s242_s14 = sand.u32 (!%p216_p9), 1, %s1782_s22   ;;  %s1396_s18 = sshll.u32 (!%p216_p9), %s1855_s25, 9 }
  0x11   : > { %v1591_v55 = vpack.c.bf16 (!%p216_p9), %v1350_v54, %v1349_v53  ;;  %v1579_v58 = vpack.c.bf16 (!%p216_p9), %v506_v57, %v505_v56  ;;  %v1351_v59 = vld [vmem:[%s2213_s4 + $0x48] sm:$0xff] (!%p216_p9)  ;;  %v1352_v60 = vld [vmem:[%s2213_s4 + $0x50] sm:$0xff] (!%p216_p9)  ;;  %v508_v63 = vld [vmem:[%s2213_s4 + $0x18] sm:$0xff] (!%p216_p9)  ;;  %s2160_s26 = scalar_lea.hbm (!%p216_p9), %s2215_s6, %s1396_s18  ;;  %s2168_s28 = scalar_lea.sflag (!%p216_p9), [#allocation3], %s242_s14 }
  0x12   : > { %v1595_v61 = vpack.c.bf16 (!%p216_p9), %v1352_v60, %v1351_v59  ;;  %v507_v62 = vld [vmem:[%s2213_s4 + $0x10] sm:$0xff] (!%p216_p9)  ;;  %v1353_v0 = vld [vmem:[%s2213_s4 + $0x58] sm:$0xff] (!%p216_p9)  ;;  %v1375_v53 = vld [vmem:[%s2213_s4 + $0x88] sm:$0xff] (!%p216_p9) }
  0x13   : > { %268 = vperm.xlu0 (!%p216_p9), %1693, %v258_v4   ;;  %1580 = vmatprep.subr.bf16.mxu1 (!%p216_p9), %v1579_v58  ;;  %v1377_v59 = vld [vmem:[%s2213_s4 + $0x98] sm:$0xff] (!%p216_p9) }
  0x14   : > { %278 = vperm.xlu1 (!%p216_p9), %1694, %v1905_v5   ;;  %1582 = vmatpush3.bf16.msra.mxu1 (!%p216_p9), %v1579_v58  ;;  %v1376_v58 = vld [vmem:[%s2213_s4 + $0x90] sm:$0xff] (!%p216_p9) }
  0x15   : > { %s246_s15 = scalar_select %p245_p10, %s1855_s25, 1 }
  0x17   : > { %s1647_s16 = smul.u32 24, %s246_s15  ;;  %1696 = vset.pattern.permute.xlu0 %v1793_v10  ;;  %s1338_s15 = sshll.u32 %s242_s14, 5 }
  0x18   : > { %1695 = vset.pattern.permute.xlu1 %v1793_v10 }
  0x19   : > { %s249_s29 = scalar_lea.vmem %s2209_s0, %s1647_s16  ;;  %438 = vperm.xlu1 %1695, %v257_v1   ;;  %s2147_s16 = scalar_lea.vmem [#allocation2], %s1338_s15 }
  0x1a   : > { %v250_v6 = vld [vmem:[%s249_s29] sm:$0xff]  ;;  %v251_v7 = vld [vmem:[%s249_s29 + $0x8] sm:$0xff]  ;;  %v252_v9 = vld [vmem:[%s249_s29 + $0x10] sm:$0x3]  ;;  %s1272_s17 = sshll.u32 %s2147_s16, 4  ;;  %s1796_s29 = smov [#allocation2]   ;;  %s2162_s17 = int_to_ptr.vmem [resolvable:$true] %s1272_s17 }
  0x1b   : > { %v1575_v8 = vpack.c.bf16 %v251_v7, %v250_v6  ;;  %s1728_s25 = scalar_lea.vmem %s2162_s17, 512  ;;  %s1732_s9 = sshll.u32 %s1796_s29, 4  ;;  %s1733_s9 = int_to_ptr.vmem [resolvable:$false] %s1732_s9 }
  0x1c   : > { %p1729_p11 = scmp.ne.s32.totalorder %s2162_s17, %s1728_s25  ;;  %s1734_s10 = scalar_lea.vmem %s1733_s9, 1024 }
  0x1d   : > { %1576 = vmatprep.subr.bf16.mxu0 %v1575_v8  ;;  %1697 = vset.pattern.permute.xlu1 %v1794_v14  ;;  %p1735_p0 = scmp.lt.s32.totalorder %s2162_s17, %s1733_s9  ;;  %p1736_p1 = scmp.lt.s32.totalorder %s1734_s10, %s1728_s25 }
  0x1e   : > { %1578 = vmatpush3.bf16.msra.mxu0 %v1575_v8  ;;  %v1355_v8 = vld [vmem:[%s2213_s4 + $0x68] sm:$0xff]  ;;  %p1730_p12 = pnand %p1729_p11, %p1872_p5 }
  0x1f   : > { %1465 = vmatprep.subr.msk.mxu0 %vm294_vm1, %v252_v9  ;;  %p1737_p2 = por %p1736_p1, %p1735_p0 }
  0x20   : > { %p1731_p13 = pneg %p1730_p12 }
  0x22   : > { %1466 = vmatpush3.msk.msra.mxu0 %vm294_vm1, %v252_v9  ;;  %v511_v9 = vld [vmem:[%s2213_s4 + $0x30] sm:$0xff]  ;;  %p1738_p3 = pnand %p1737_p2, %p1731_p13 }
  0x23   : > { %1468 = vmatmul.mubr.msk.f32.vlgmr.msra.gmra.mrb[0].mxu0 %vm281_vm0, %v254_v11  ;;  %1592 = vmatprep.subr.bf16.mxu0 %v1591_v55  ;;  %v1372_v11 = vld [vmem:[%s2213_s4 + $0x70] sm:$0xff] }
  0x24   : > { %1470 = vmatprep.mubr.msk.f32.mxu0 %vm281_vm0, %v255_v12  ;;  %1594 = vmatpush3.bf16.msra.mxu0 %v1591_v55 }
  0x25   : > { %1596 = vmatprep.subr.bf16.mxu0 %v1595_v61 }
  0x27   : > { %1471 = vmatmul.mubr.msk.f32.gmra.mrb[2].mxu0 %vm281_vm0, %v256_v13 }
  0x28   : > { %1598 = vmatpush3.bf16.msra.mxu0 %v1595_v61 }
  0x8e   : > { %v264_v15 = vpop.permute.xlu0 %263 }
  0x8f   : > { %v274_v16 = vpop.permute.xlu1 %273 }
  0x92   : > { %v269_v17 = vpop.permute.xlu0 %268 }
  0x93   : > { %v279_v23 = vpop.permute.xlu1 %278 }
  0x98   : > { %v1941_v32 = vpop.permute.xlu1 %438 }
  0xf6   : > { %v1469_v18 = vpop.f32.mrb[0].mxu0 }
  0xf7   : > { %v370_v19 = vadd.f32 %v1469_v18, %v269_v17  ;;  %v364_v20 = vpop.f32.mrb[1].mxu0 }
  0xf8   : > { %v365_v21 = vadd.f32 %v364_v20, %v264_v15 }
  0xf9   : > { %v387_v22 = vsel %vm383_vm2, %v370_v19, 0.0 }
  0xfa   : > { %388 = vadd.xlane.f32.xlu1 %v387_v22  ;;  %v1472_v24 = vpop.f32.mrb[2].mxu0  ;;  %v384_v25 = vsel %vm383_vm2, %v365_v21, 0.0 }
  0xfb   : > { %v380_v26 = vadd.f32 %v1472_v24, %v279_v23  ;;  %v374_v27 = vpop.f32.mrb[3].mxu0  ;;  %385 = vadd.xlane.f32.xlu0 %v384_v25 }
  0xfc   : > { %v375_v29 = vadd.f32 %v374_v27, %v274_v16 }
  0xfd   : > { %v393_v28 = vsel %vm383_vm2, %v380_v26, 0.0 }
  0xfe   : > { %v390_v30 = vsel %vm383_vm2, %v375_v29, 0.0 }
  0xff   : > { %394 = vadd.xlane.f32.xlu0 %v393_v28 }
 0x103   : > { %391 = vadd.xlane.f32.xlu0 %v390_v30 }
 0x10b   : > { %458 = vperm.xlu1 %1697, %v257_v1  }
 0x10f   : > { %462 = vperm.xlu1 %1697, %v258_v4  }
 0x113   : > { %1698 = vset.pattern.permute.xlu1 %v1793_v10 }
 0x114   : > { %446 = vperm.xlu1 %1698, %v1893_v2  }
 0x118   : > { %1699 = vset.pattern.permute.xlu1 %v1795_v31 }
 0x119   : > { %482 = vperm.xlu1 %1699, %v257_v1   ;;  %442 = vperm.xlu0 %1696, %v258_v4   ;;  %v1583_v1 = vpack.c.bf16 %v508_v63, %v507_v62  ;;  %v1627_v63 = vpack.c.bf16 %v1377_v59, %v1376_v58 }
 0x11b   : > { %1584 = vmatprep.subr.bf16.mxu1 %v1583_v1 }
 0x11c   : > { %1586 = vmatpush3.bf16.msra.mxu1 %v1583_v1 }
 0x11d   : > { %1700 = vset.pattern.permute.xlu1 %v1793_v10  ;;  %1703 = vset.pattern.permute.xlu0 %v1795_v31 }
 0x11e   : > { %450 = vperm.xlu1 %1700, %v1905_v5  }
 0x122   : > { %1701 = vset.pattern.permute.xlu1 %v1795_v31 }
 0x123   : > { %486 = vperm.xlu1 %1701, %v258_v4   ;;  %v509_v4 = vld [vmem:[%s2213_s4 + $0x20] sm:$0xff] }
 0x127   : > { %1702 = vset.pattern.permute.xlu1 %v1794_v14 }
 0x128   : > { %466 = vperm.xlu1 %1702, %v1893_v2  }
 0x12c   : > { %470 = vperm.xlu1 %1702, %v1905_v5  }
 0x130   : > { %1704 = vset.pattern.permute.xlu1 %v1795_v31 }
 0x187   : > { %v389_v33 = vpop.xlane.xlu1 %388 }
 0x188   : > { %v398_v34 = vmul.f32 0.017857144, %v389_v33  ;;  %v386_v35 = vpop.xlane.xlu0 %385 }
 0x189   : > { %v397_v36 = vmul.f32 0.017857144, %v386_v35 }
 0x18a   : > { %v1943_v37 = vsub.f32 %v370_v19, %v398_v34 }
 0x18b   : > { %v1945_v38 = vsub.f32 %v365_v21, %v397_v36  ;;  %v459_v13 = vpop.permute.xlu1 %458 }
 0x18c   : > { %v395_v39 = vpop.xlane.xlu0 %394  ;;  %v406_v40 = vmul.f32 %v1943_v37, %v1943_v37 }
 0x18d   : > { %v400_v41 = vmul.f32 0.017857144, %v395_v39  ;;  %v405_v42 = vmul.f32 %v1945_v38, %v1945_v38 }
 0x18e   : > { %v412_v43 = vsel %vm383_vm2, %v406_v40, 0.0 }
 0x18f   : > { %v1952_v44 = vsub.f32 %v380_v26, %v400_v41  ;;  %413 = vadd.xlane.f32.xlu0 %v412_v43  ;;  %v409_v45 = vsel %vm383_vm2, %v405_v42, 0.0  ;;  %v463_v15 = vpop.permute.xlu1 %462 }
 0x190   : > { %410 = vadd.xlane.f32.xlu1 %v409_v45  ;;  %v392_v46 = vpop.xlane.xlu0 %391 }
 0x191   : > { %v399_v47 = vmul.f32 0.017857144, %v392_v46  ;;  %v408_v48 = vmul.f32 %v1952_v44, %v1952_v44 }
 0x193   : > { %v1957_v49 = vsub.f32 %v375_v29, %v399_v47  ;;  %v418_v50 = vsel %vm383_vm2, %v408_v48, 0.0  ;;  %v447_v16 = vpop.permute.xlu1 %446 }
 0x194   : > { %419 = vadd.xlane.f32.xlu0 %v418_v50 }
 0x195   : > { %v407_v51 = vmul.f32 %v1957_v49, %v1957_v49 }
 0x197   : > { %v415_v52 = vsel %vm383_vm2, %v407_v51, 0.0 }
 0x198   : > { %416 = vadd.xlane.f32.xlu1 %v415_v52  ;;  %v483_v17 = vpop.permute.xlu1 %482  ;;  %v443_v21 = vpop.permute.xlu0 %442  ;;  %v1374_v52 = vld [vmem:[%s2213_s4 + $0x80] sm:$0xff] }
 0x199   : > { %v1623_v55 = vpack.c.bf16 %v1375_v53, %v1374_v52 }
 0x19d   : > { %v451_v18 = vpop.permute.xlu1 %450 }
 0x1a2   : > { %v487_v19 = vpop.permute.xlu1 %486 }
 0x1a7   : > { %v467_v20 = vpop.permute.xlu1 %466 }
 0x1a9   : > { %494 = vperm.xlu1 %1704, %v1905_v5   ;;  %v510_v5 = vld [vmem:[%s2213_s4 + $0x28] sm:$0xff] }
 0x1aa   : > { %490 = vperm.xlu0 %1703, %v1893_v2   ;;  %v1354_v2 = vld [vmem:[%s2213_s4 + $0x60] sm:$0xff]  ;;  %v1587_v7 = vpack.c.bf16 %v510_v5, %v509_v4 }
 0x1ab   : > { %v1599_v6 = vpack.c.bf16 %v1354_v2, %v1353_v0  ;;  %v471_v22 = vpop.permute.xlu1 %470  ;;  %v1378_v5 = vld [vmem:[%s2213_s4 + $0xa0] sm:$0xff] }
 0x1ac   : > { %1588 = vmatprep.subr.bf16.mxu1 %v1587_v7 }
 0x1ad   : > { %1705 = vset.pattern.permute.xlu1 %v1792_v3  ;;  %1600 = vmatprep.subr.bf16.mxu0 %v1599_v6 }
 0x1ae   : > { %1706 = vset.pattern.permute.xlu0 %v1792_v3  ;;  %1602 = vmatpush3.bf16.msra.mxu0 %v1599_v6  ;;  %v1373_v3 = vld [vmem:[%s2213_s4 + $0x78] sm:$0xff]  ;;  %v1360_v6 = vld [vmem:[%s2212_s3 + $0x20] sm:$0xff] }
 0x1af   : > { %1590 = vmatpush3.bf16.msra.mxu1 %v1587_v7  ;;  %1505 = vmatprep.subr.mxu0 %v1355_v8  ;;  %v1619_v12 = vpack.c.bf16 %v1373_v3, %v1372_v11  ;;  %v2054_v7 = vld [vmem:[%s2214_s5] sm:$0xff]  ;;  %v2073_v11 = vld [vmem:[%s2214_s5 + $0x18] sm:$0xff] }
 0x1b0   : > { %1485 = vmatprep.subr.mxu1 %v511_v9  ;;  %1111 = vperm.xlu1 %1705, %v2054_v7  }
 0x1b2   : > { %1506 = vmatpush3.msra.mxu0 %v1355_v8  ;;  %v2059_v8 = vld [vmem:[%s2214_s5 + $0x8] sm:$0xff] }
 0x1b3   : > { %1486 = vmatpush3.msra.mxu1 %v511_v9  ;;  %1620 = vmatprep.subr.bf16.mxu0 %v1619_v12  ;;  %v2066_v9 = vld [vmem:[%s2214_s5 + $0x10] sm:$0xff] }
 0x1b4   : > { %1116 = vperm.xlu0 %1706, %v2059_v8   ;;  %1121 = vperm.xlu1 %1705, %v2066_v9  }
 0x1b8   : > { %1708 = vset.pattern.permute.xlu0 %v1793_v10  ;;  %1126 = vperm.xlu1 %1705, %v2073_v11  }
 0x1bc   : > { %1707 = vset.pattern.permute.xlu1 %v1793_v10  ;;  %v1361_v10 = vld [vmem:[%s2212_s3 + $0x28] sm:$0xff] }
 0x1bd   : > { %1187 = vperm.xlu1 %1707, %v2054_v7  }
 0x21c   : > { %v414_v23 = vpop.xlane.xlu0 %413 }
 0x21d   : > { %v422_v24 = vmul.f32 0.017857144, %v414_v23  ;;  %v411_v25 = vpop.xlane.xlu1 %410 }
 0x21e   : > { %v421_v26 = vmul.f32 0.017857144, %v411_v25  ;;  %v1362_v25 = vld [vmem:[%s2212_s3 + $0x30] sm:$0xff] }
 0x21f   : > { %v426_v27 = vadd.f32 1e-05, %v422_v24 }
 0x220   : > { %v425_v28 = vadd.f32 1e-05, %v421_v26 }
 0x221   : > { %1712 = vrsqrt.f32 %v426_v27  ;;  %v420_v29 = vpop.xlane.xlu0 %419 }
 0x222   : > { %1714 = vrsqrt.f32 %v425_v28  ;;  %v424_v30 = vmul.f32 0.017857144, %v420_v29  ;;  %v1363_v28 = vld [vmem:[%s2212_s3 + $0x38] sm:$0xff] }
 0x224   : > { %v428_v33 = vadd.f32 1e-05, %v424_v30  ;;  %v609_v30 = vld [vmem:[%s2212_s3] sm:$0xff] }
 0x225   : > { %v417_v34 = vpop.xlane.xlu1 %416 }
 0x226   : > { %1716 = vrsqrt.f32 %v428_v33  ;;  %v423_v35 = vmul.f32 0.017857144, %v417_v34 }
 0x228   : > { %v427_v36 = vadd.f32 1e-05, %v423_v35  ;;  %v610_v35 = vld [vmem:[%s2212_s3 + $0x8] sm:$0xff] }
 0x229   : > { %v495_v60 = vpop.permute.xlu1 %494  ;;  %v491_v61 = vpop.permute.xlu0 %490 }
 0x22a   : > { %1718 = vrsqrt.f32 %v427_v36  ;;  %v611_v36 = vld [vmem:[%s2212_s3 + $0x10] sm:$0xff] }
 0x22b   : > { %v1713_v39 = vpop.eup %1712 }
 0x22c   : > { %v1715_v40 = vpop.eup %1714  ;;  %v434_v41 = vmul.f32 %v1713_v39, %v1943_v37  ;;  %v612_v39 = vld [vmem:[%s2212_s3 + $0x18] sm:$0xff] }
 0x22d   : > { %v433_v42 = vmul.f32 %v1715_v40, %v1945_v38  ;;  %v1383_v40 = vld [vmem:[%s2212_s3 + $0x40] sm:$0xff] }
 0x22e   : > { %v454_v43 = vmul.f32 %v443_v21, %v434_v41  ;;  %v1384_v41 = vld [vmem:[%s2212_s3 + $0x48] sm:$0xff] }
 0x22f   : > { %v453_v45 = vmul.f32 %v1941_v32, %v433_v42  ;;  %v1385_v42 = vld [vmem:[%s2212_s3 + $0x50] sm:$0xff] }
 0x230   : > { %v1717_v46 = vpop.eup %1716  ;;  %v474_v47 = vadd.f32 %v463_v15, %v454_v43  ;;  %v1386_v43 = vld [vmem:[%s2212_s3 + $0x58] sm:$0xff] }
 0x231   : > { %v473_v48 = vadd.f32 %v459_v13, %v453_v45  ;;  %v436_v50 = vmul.f32 %v1717_v46, %v1952_v44  ;;  %v1112_v45 = vpop.permute.xlu1 %1111 }
 0x232   : > { %v498_v51 = vmul.f32 %v487_v19, %v474_v47  ;;  %vm478_vm4 = vcmp.ge.f32.partialorder %v474_v47, 0.0 }
 0x233   : > { %vm477_vm3 = vcmp.ge.f32.partialorder %v473_v48, 0.0  ;;  %v497_v37 = vmul.f32 %v483_v17, %v473_v48  ;;  %v456_v38 = vmul.f32 %v451_v18, %v436_v50 }
 0x234   : > { %v1719_v54 = vpop.eup %1718  ;;  %v502_v57 = vsel %vm478_vm4, %v474_v47, %v498_v51  ;;  %v1117_v47 = vpop.permute.xlu0 %1116 }
 0x235   : > { %v501_v32 = vsel %vm477_vm3, %v473_v48, %v497_v37  ;;  %v435_v56 = vmul.f32 %v1719_v54, %v1957_v49  ;;  %v476_v44 = vadd.f32 %v471_v22, %v456_v38  ;;  %v1122_v46 = vpop.permute.xlu1 %1121 }
 0x236   : > { %1487 = vmatprep.mubr.msk.f32.mxu1 %vm383_vm2, %v501_v32  ;;  %1507 = vmatprep.mubr.msk.f32.mxu0 %vm383_vm2, %v501_v32 }
 0x237   : > { %1488 = vmatmul.mubr.msk.f32.vlgmr.msra.gmra.mrb[0].mxu1 %vm383_vm2, %v502_v57  ;;  %1508 = vmatmul.mubr.msk.f32.vlgmr.msra.gmra.mrb[4].mxu0 %vm383_vm2, %v502_v57  ;;  %v455_v49 = vmul.f32 %v447_v16, %v435_v56  ;;  %v500_v0 = vmul.f32 %v495_v60, %v476_v44  ;;  %vm480_vm6 = vcmp.ge.f32.partialorder %v476_v44, 0.0 }
 0x238   : > { %1622 = vmatpush3.bf16.msra.mxu0 %v1619_v12 }
 0x239   : > { %1624 = vmatprep.subr.bf16.mxu0 %v1623_v55  ;;  %v475_v62 = vadd.f32 %v467_v20, %v455_v49  ;;  %v504_v4 = vsel %vm480_vm6, %v476_v44, %v500_v0  ;;  %v1127_v37 = vpop.permute.xlu1 %1126 }
 0x23b   : > { %v499_v1 = vmul.f32 %v491_v61, %v475_v62  ;;  %vm479_vm5 = vcmp.ge.f32.partialorder %v475_v62, 0.0 }
 0x23c   : > { %1626 = vmatpush3.bf16.msra.mxu0 %v1623_v55 }
 0x23d   : > { %v503_v2 = vsel %vm479_vm5, %v475_v62, %v499_v1  ;;  %1628 = vmatprep.subr.bf16.mxu0 %v1627_v63  ;;  %v1188_v58 = vpop.permute.xlu1 %1187 }
 0x23e   : > { %1490 = vmatprep.mubr.msk.f32.mxu1 %vm383_vm2, %v503_v2  ;;  %1510 = vmatprep.mubr.msk.f32.mxu0 %vm383_vm2, %v503_v2 }
 0x23f   : > { %1491 = vmatmul.mubr.msk.f32.gmra.mrb[2].mxu1 %vm383_vm2, %v504_v4  ;;  %1511 = vmatmul.mubr.msk.f32.gmra.mrb[6].mxu0 %vm383_vm2, %v504_v4 }
 0x240   : > { %1630 = vmatpush3.bf16.msra.mxu0 %v1627_v63  ;;  %1555 = vmatprep.mubr.msk.f32.mxu0 %vm383_vm2, %v501_v32 }
 0x241   : > { %1553 = vmatprep.subr.mxu0 %v1378_v5  ;;  %1521 = vmatprep.mubr.msk.f32.mxu1 %vm711_vm7, %v1360_v6 }
 0x244   : > { %1554 = vmatpush3.msra.mxu0 %v1378_v5 }
 0x245   : > { %1556 = vmatmul.mubr.msk.f32.vlgmr.msra.gmra.mrb[8].mxu0 %vm383_vm2, %v502_v57 }
 0x246   : > { %1558 = vmatprep.mubr.msk.f32.mxu0 %vm383_vm2, %v503_v2 }
 0x249   : > { %1559 = vmatmul.mubr.msk.f32.gmra.mrb[10].mxu0 %vm383_vm2, %v504_v4 }
 0x30a   : > { %v1489_v3 = vpop.f32.mrb[0].mxu1  ;;  %v1509_v12 = vpop.f32.mrb[4].mxu0 }
 0x30b   : > { %v590_v13 = vpop.f32.mrb[1].mxu1  ;;  %v687_v15 = vpop.f32.mrb[5].mxu0 }
 0x30c   : > { %v1611_v16 = vpack.c.bf16 %v1489_v3, %v590_v13  ;;  %v1603_v17 = vpack.c.bf16 %v1509_v12, %v687_v15 }
 0x30e   : > { %1604 = vmatprep.subr.bf16.mxu1 %v1603_v17 }
 0x30f   : > { %1606 = vmatpush3.bf16.msra.mxu1 %v1603_v17 }
 0x312   : > { %v1492_v18 = vpop.f32.mrb[2].mxu1  ;;  %v1512_v19 = vpop.f32.mrb[6].mxu0 }
 0x313   : > { %v600_v20 = vpop.f32.mrb[3].mxu1  ;;  %v697_v21 = vpop.f32.mrb[7].mxu0 }
 0x314   : > { %v1615_v22 = vpack.c.bf16 %v1492_v18, %v600_v20  ;;  %v1607_v23 = vpack.c.bf16 %v1512_v19, %v697_v21 }
 0x316   : > { %1608 = vmatprep.subr.bf16.mxu1 %v1607_v23 }
 0x317   : > { %1610 = vmatpush3.bf16.msra.mxu1 %v1607_v23 }
 0x318   : > { %v1557_v24 = vpop.f32.mrb[8].mxu0  ;;  %1612 = vmatprep.subr.bf16.mxu1 %v1611_v16 }
 0x319   : > { %v980_v26 = vpop.f32.mrb[9].mxu0 }
 0x31a   : > { %v1631_v27 = vpack.c.bf16 %v1557_v24, %v980_v26  ;;  %1522 = vmatmul.mubr.msk.f32.vlgmr.msra.gmra.mrb[4].mxu1 %vm711_vm7, %v1361_v10 }
 0x31b   : > { %1614 = vmatpush3.bf16.msra.mxu1 %v1611_v16  ;;  %1524 = vmatprep.mubr.msk.f32.mxu1 %vm711_vm7, %v1362_v25 }
 0x31c   : > { %v1560_v29 = vpop.f32.mrb[10].mxu0  ;;  %1616 = vmatprep.subr.bf16.mxu1 %v1615_v22 }
 0x31d   : > { %v990_v33 = vpop.f32.mrb[11].mxu0 }
 0x31e   : > { %v1635_v34 = vpack.c.bf16 %v1560_v29, %v990_v33  ;;  %1525 = vmatmul.mubr.msk.f32.gmra.mrb[6].mxu1 %vm711_vm7, %v1363_v28 }
 0x31f   : > { %1618 = vmatpush3.bf16.msra.mxu1 %v1615_v22  ;;  %1535 = vmatprep.mubr.msk.f32.mxu1 %vm711_vm7, %v609_v30 }
 0x320   : > { %1632 = vmatprep.subr.bf16.mxu1 %v1631_v27 }
 0x322   : > { %1536 = vmatmul.mubr.msk.f32.vlgmr.msra.gmra.mrb[4].mxu1 %vm711_vm7, %v610_v35 }
 0x323   : > { %1634 = vmatpush3.bf16.msra.mxu1 %v1631_v27  ;;  %1538 = vmatprep.mubr.msk.f32.mxu1 %vm711_vm7, %v611_v36 }
 0x324   : > { %1636 = vmatprep.subr.bf16.mxu1 %v1635_v34 }
 0x326   : > { %1539 = vmatmul.mubr.msk.f32.gmra.mrb[6].mxu1 %vm711_vm7, %v612_v39 }
 0x327   : > { %1638 = vmatpush3.bf16.msra.mxu1 %v1635_v34  ;;  %1569 = vmatprep.mubr.msk.f32.mxu1 %vm711_vm7, %v1383_v40 }
 0x32a   : > { %1570 = vmatmul.mubr.msk.f32.vlgmr.msra.gmra.mrb[4].mxu1 %vm711_vm7, %v1384_v41 }
 0x32b   : > { %1572 = vmatprep.mubr.msk.f32.mxu1 %vm711_vm7, %v1385_v42 }
 0x32e   : > { %1573 = vmatmul.mubr.msk.f32.gmra.mrb[6].mxu1 %vm711_vm7, %v1386_v43 }
 0x3fd   : > { %v1571_v48 = vpop.f32.mrb[4].mxu1 }
 0x3fe   : > { %v1130_v50 = vadd.f32 %v1571_v48, %v1117_v47  ;;  %v1082_v51 = vpop.f32.mrb[5].mxu1 }
 0x3ff   : > { %v1129_v52 = vadd.f32 %v1112_v45, %v1082_v51 }
 0x400   : > { %v1136_v53 = vsel %vm711_vm7, %v1130_v50, 0.0 }
 0x401   : > { %v1574_v38 = vpop.f32.mrb[6].mxu1  ;;  %1137 = vadd.xlane.f32.xlu1 %v1136_v53  ;;  %v1133_v54 = vsel %vm711_vm7, %v1129_v52, 0.0 }
 0x402   : > { %v1132_v32 = vadd.f32 %v1574_v38, %v1127_v37  ;;  %1134 = vadd.xlane.f32.xlu0 %v1133_v54  ;;  %v1092_v55 = vpop.f32.mrb[7].mxu1 }
 0x403   : > { %v1131_v44 = vadd.f32 %v1122_v46, %v1092_v55 }
 0x404   : > { %v1142_v56 = vsel %vm711_vm7, %v1132_v32, 0.0 }
 0x405   : > { %v1139_v57 = vsel %vm711_vm7, %v1131_v44, 0.0 }
 0x406   : > { %1143 = vadd.xlane.f32.xlu0 %v1142_v56 }
 0x40a   : > { %1140 = vadd.xlane.f32.xlu0 %v1139_v57 }
 0x412   : > { %1195 = vperm.xlu1 %1707, %v2066_v9  }
 0x416   : > { %1199 = vperm.xlu1 %1707, %v2073_v11  }
 0x41a   : > { %1709 = vset.pattern.permute.xlu1 %v1794_v14 }
 0x41b   : > { %1207 = vperm.xlu1 %1709, %v2054_v7  }
 0x41f   : > { %1211 = vperm.xlu1 %1709, %v2059_v8  }
 0x420   : > { %1191 = vperm.xlu0 %1708, %v2059_v8  }
 0x423   : > { %1215 = vperm.xlu1 %1709, %v2066_v9  }
 0x424   : > { %1711 = vset.pattern.permute.xlu0 %v1795_v31 }
 0x427   : > { %1219 = vperm.xlu1 %1709, %v2073_v11  }
 0x42b   : > { %1710 = vset.pattern.permute.xlu1 %v1795_v31 }
 0x42c   : > { %1231 = vperm.xlu1 %1710, %v2054_v7  }
 0x48e   : > { %v1138_v59 = vpop.xlane.xlu1 %1137 }
 0x48f   : > { %v1147_v60 = vmul.f32 0.03125, %v1138_v59  ;;  %v1135_v14 = vpop.xlane.xlu0 %1134 }
 0x490   : > { %v1146_v49 = vmul.f32 0.03125, %v1135_v14 }
 0x491   : > { %v1151_v61 = vsub.f32 %v1130_v50, %v1147_v60 }
 0x492   : > { %v1150_v62 = vsub.f32 %v1129_v52, %v1146_v49  ;;  %v1196_v17 = vpop.permute.xlu1 %1195 }
 0x493   : > { %v1144_v63 = vpop.xlane.xlu0 %1143  ;;  %v1155_v0 = vmul.f32 %v1151_v61, %v1151_v61 }
 0x494   : > { %v1149_v1 = vmul.f32 0.03125, %v1144_v63  ;;  %v1154_v2 = vmul.f32 %v1150_v62, %v1150_v62 }
 0x495   : > { %v1161_v4 = vsel %vm711_vm7, %v1155_v0, 0.0 }
 0x496   : > { %v1153_v5 = vsub.f32 %v1132_v32, %v1149_v1  ;;  %1162 = vadd.xlane.f32.xlu0 %v1161_v4  ;;  %v1158_v6 = vsel %vm711_vm7, %v1154_v2, 0.0  ;;  %v1200_v18 = vpop.permute.xlu1 %1199 }
 0x497   : > { %1159 = vadd.xlane.f32.xlu1 %v1158_v6  ;;  %v1141_v3 = vpop.xlane.xlu0 %1140 }
 0x498   : > { %v1157_v31 = vmul.f32 %v1153_v5, %v1153_v5  ;;  %v1148_v12 = vmul.f32 0.03125, %v1141_v3 }
 0x49a   : > { %v1167_v7 = vsel %vm711_vm7, %v1157_v31, 0.0  ;;  %v1152_v13 = vsub.f32 %v1131_v44, %v1148_v12  ;;  %v1208_v19 = vpop.permute.xlu1 %1207 }
 0x49b   : > { %1168 = vadd.xlane.f32.xlu0 %v1167_v7 }
 0x49c   : > { %v1156_v15 = vmul.f32 %v1152_v13, %v1152_v13 }
 0x49e   : > { %v1164_v16 = vsel %vm711_vm7, %v1156_v15, 0.0  ;;  %v1212_v20 = vpop.permute.xlu1 %1211 }
 0x49f   : > { %v1192_v23 = vpop.permute.xlu0 %1191 }
 0x4a2   : > { %v1216_v21 = vpop.permute.xlu1 %1215 }
 0x4a6   : > { %v1220_v22 = vpop.permute.xlu1 %1219 }
 0x4a8   : > { %1239 = vperm.xlu1 %1710, %v2066_v9  }
 0x4ab   : > { %v1232_v9 = vpop.permute.xlu1 %1231 }
 0x4b1   : > { %1235 = vperm.xlu0 %1711, %v2059_v8  }
 0x4cc   : > { %1165 = vadd.xlane.f32.xlu1 %v1164_v16 }
 0x4dd   : > { %1243 = vperm.xlu1 %1710, %v2073_v11  }
 0x523   : > { %v1163_v10 = vpop.xlane.xlu0 %1162 }
 0x524   : > { %v1171_v8 = vmul.f32 0.03125, %v1163_v10  ;;  %v1160_v24 = vpop.xlane.xlu1 %1159 }
 0x525   : > { %v1170_v25 = vmul.f32 0.03125, %v1160_v24 }
 0x526   : > { %v1175_v26 = vadd.f32 1e-05, %v1171_v8 }
 0x527   : > { %v1174_v27 = vadd.f32 1e-05, %v1170_v25 }
 0x528   : > { %1720 = vrsqrt.f32 %v1175_v26  ;;  %v1169_v11 = vpop.xlane.xlu0 %1168  ;;  %v1240_v51 = vpop.permute.xlu1 %1239 }
 0x529   : > { %1722 = vrsqrt.f32 %v1174_v27  ;;  %v1173_v46 = vmul.f32 0.03125, %v1169_v11 }
 0x52b   : > { %v1177_v47 = vadd.f32 1e-05, %v1173_v46 }
 0x52d   : > { %1724 = vrsqrt.f32 %v1177_v47 }
 0x530   : > { %v1236_v36 = vpop.permute.xlu0 %1235 }
 0x532   : > { %v1721_v28 = vpop.eup %1720 }
 0x533   : > { %v1723_v29 = vpop.eup %1722  ;;  %v1183_v30 = vmul.f32 %v1721_v28, %v1151_v61 }
 0x534   : > { %v1182_v33 = vmul.f32 %v1723_v29, %v1150_v62 }
 0x535   : > { %v1203_v34 = vmul.f32 %v1192_v23, %v1183_v30 }
 0x536   : > { %v1202_v35 = vmul.f32 %v1188_v58, %v1182_v33 }
 0x537   : > { %v1223_v39 = vadd.f32 %v1212_v20, %v1203_v34  ;;  %v1725_v48 = vpop.eup %1724 }
 0x538   : > { %v1222_v40 = vadd.f32 %v1208_v19, %v1202_v35  ;;  %v1185_v50 = vmul.f32 %v1725_v48, %v1153_v5 }
 0x539   : > { %vm1227_vm8 = vcmp.ge.f32.partialorder %v1223_v39, 0.0  ;;  %v1247_v41 = vmul.f32 %v1236_v36, %v1223_v39 }
 0x53a   : > { %vm1226_vm9 = vcmp.ge.f32.partialorder %v1222_v40, 0.0  ;;  %v1246_v42 = vmul.f32 %v1232_v9, %v1222_v40  ;;  %v1205_v52 = vmul.f32 %v1200_v18, %v1185_v50 }
 0x53b   : > { %v1251_v43 = vsel %vm1227_vm8, %v1223_v39, %v1247_v41 }
 0x53c   : > { %v1250_v45 = vsel %vm1226_vm9, %v1222_v40, %v1246_v42  ;;  %1255 = vst.msk [vmem:[%s2147_s16 + $0x8] sm:$0xff] %vm711_vm7, %v1251_v43  ;;  %v1225_v38 = vadd.f32 %v1220_v22, %v1205_v52 }
 0x53d   : > { %1254 = vst.msk [vmem:[%s2147_s16] sm:$0xff] %vm711_vm7, %v1250_v45 }
 0x53e   : > { %vm1229_vm10 = vcmp.ge.f32.partialorder %v1225_v38, 0.0 }
 0x559   : > { %v1166_v53 = vpop.xlane.xlu1 %1165 }
 0x55a   : > { %v1172_v37 = vmul.f32 0.03125, %v1166_v53 }
 0x55c   : > { %v1176_v54 = vadd.f32 1e-05, %v1172_v37 }
 0x55d   : > { %v1244_v32 = vpop.permute.xlu1 %1243 }
 0x55e   : > { %1726 = vrsqrt.f32 %v1176_v54  ;;  %v1249_v55 = vmul.f32 %v1244_v32, %v1225_v38 }
 0x560   : > { %v1253_v56 = vsel %vm1229_vm10, %v1225_v38, %v1249_v55 }
 0x561   : > { %1257 = vst.msk [vmem:[%s2147_s16 + $0x18] sm:$0xff] %vm711_vm7, %v1253_v56 }
 0x568   : > { %v1727_v44 = vpop.eup %1726 }
 0x569   : > { %v1184_v57 = vmul.f32 %v1727_v44, %v1152_v13 }
 0x56b   : > { %v1204_v58 = vmul.f32 %v1196_v17, %v1184_v57 }
 0x56d   : > { %v1224_v59 = vadd.f32 %v1216_v21, %v1204_v58 }
 0x56f   : > { %vm1228_vm11 = vcmp.ge.f32.partialorder %v1224_v59, 0.0  ;;  %v1248_v60 = vmul.f32 %v1240_v51, %v1224_v59 }
 0x571   : > { %v1252_v14 = vsel %vm1228_vm11, %v1224_v59, %v1248_v60 }
 0x572   : > { %1256 = vst.msk [vmem:[%s2147_s16 + $0x10] sm:$0xff] %vm711_vm7, %v1252_v14 }
 0x573   : > { %1741 = shalt.err (!%p1738_p3)
}
 0x574   : > { %s1742_s11 = scalar_lea.hbm %s2160_s26, 512  ;;  %s1746_s14 = scalar_lea.hbm %s2215_s6, 1024 }
 0x575   : > { %p1743_p4 = scmp.ne.s32.totalorder %s2160_s26, %s1742_s11  ;;  %p1747_p9 = scmp.lt.u32.totalorder %s2160_s26, %s2215_s6 }
 0x576   : > { %p1748_p10 = scmp.lt.u32.totalorder %s1746_s14, %s1742_s11  ;;  %p1750_p12 = scmp.lt.u32.totalorder %s1742_s11, %s2160_s26 }
 0x577   : > { %p1744_p7 = pnand %p1743_p4, %p1872_p5 }
 0x578   : > { %p1749_p11 = por %p1748_p10, %p1747_p9 }
 0x579   : > { %p1745_p8 = pneg %p1744_p7 }
 0x57a   : > { %p1751_p13 = por %p1750_p12, %p1749_p11 }
 0x57c   : > { %p1752_p0 = pnand %p1751_p13, %p1745_p8 }
 0x57e   : > { %1755 = shalt.err (!%p1752_p0)
}
 0x57f   : > { %s1797_s18 = smov 128   ;;  %s1798_s19 = smov 8  }
 0x580   : > { %1648 = dma.vmem_to_hbm [thread:$0]  (%p1872_p5), %s2162_s17, 512, %s2160_s26, %s2168_s28, %s1797_s18, %s1797_s18, %s1798_s19  }
 0x581 PF: > { %p1654_p1 = scmp.ge.s32.totalorder %s1790_s24, 2  ;;  %s1287_s20 = sand.u32 1, %s1778_s21  }
 0x582   : > { %s1288_s25 = scalar_lea.sflag [#allocation3], %s1287_s20 }
 0x583   : > { %p1651_p2 = pnand %p1654_p1, %p1876_p6 }
 0x585   : > { %1773 = dma.done.wait (!%p1651_p2), %s1288_s25, 512  }
 0x586   : > { %1775 = vsyncadd (!%p1651_p2), %s1288_s25, 4294966784  ;;  %p16_p3 = scmp.ge.s32.totalorder %s1859_s27, 4   ;;  %s2218_s21 = smov %s1782_s22 }
 0x587   : > { %s2219_s22 = smov %s1786_s23  ;;  %s2220_s23 = smov %s1870_s30 }
 0x588   : > { %s2221_s24 = smov %s1859_s27  ;;  %18 = sbr.rel (!%p16_p3) target bundleno = 3 (0x3), region = 83 }
 0x58f   :  { %1293 = vsyncpa [#allocation3], 1 }
 0x590   :  { %1295 = vsyncpa [#allocation3 + $0x1], 1 }

</bundles_post_ra>
